<compile_context>
chip_gen: v5e
topology: v5e:2x2
jax: 0.10.0
libtpu: 0.0.40
codegen_flags: <defaults>
</compile_context>

<pallas_src>
import functools

import jax
import jax.numpy as jnp
from jax.experimental import pallas as pl
from jax.experimental.pallas import tpu as pltpu

_LANES = 128
_SUB = 8          # sublanes of the lane-resident accumulator
_CHUNK = 32       # rows processed per inner-loop step (legal tile for i8/bf16/f32)
_N_CLS = 2        # the loss only ever uses class planes 0 and 1


def _device_default_row_tile():
    """Row-tile default by chip generation (v5-class keeps a smaller tile)."""
    try:
        kind = jax.devices()[0].device_kind.lower()
    except Exception:
        kind = ""
    if any(tag in kind for tag in ("v2", "v3", "v4", "v5")):
        return 4096
    return 8192   # v6e / v7x / unknown-newer


def _dice_stats_kernel(pr_ref, gt_ref, out_ref, *, chunk, num_row_blocks,
                       blocks_per_super, rows_total, block_rows,
                       has_tail, needs_skip):
    """Accumulate lane-resident [inter0, inter1, psum0, psum1, tsum0, tsum1].

    pr_ref : (2, R, 128)      probability planes for classes 0 and 1 (any float dtype)
    gt_ref : (R, 128)         integer labels (narrow dtype ok)
    out_ref: (6, 8, 128) f32  revisited output block used as the accumulator
    """
    s = pl.program_id(1)
    r = pl.program_id(2)
    rb = s * blocks_per_super + r            # global row-block index

    @pl.when(r == 0)
    def _():
        out_ref[...] = jnp.zeros_like(out_ref)

    sub, lanes = out_ref.shape[-2], out_ref.shape[-1]
    fold_steps = block_rows // chunk         # block_rows is a multiple of chunk

    def accumulate(masked):
        def body(i, carry):
            off = pl.multiple_of(i * chunk, chunk)
            g = gt_ref[pl.ds(off, chunk), :]
            p0 = pr_ref[0, pl.ds(off, chunk), :].astype(jnp.float32)
            p1 = pr_ref[1, pl.ds(off, chunk), :].astype(jnp.float32)
            o0 = g == 0
            o1 = g == 1
            if masked:
                # Only the last (partial) row block ever runs this branch.
                rows = (rb * block_rows + off
                        + jax.lax.broadcasted_iota(jnp.int32, (chunk, lanes), 0))
                valid = rows < rows_total
                p0 = jnp.where(valid, p0, 0.0)   # kill garbage before any math
                p1 = jnp.where(valid, p1, 0.0)
                o0 = jnp.logical_and(o0, valid)
                o1 = jnp.logical_and(o1, valid)
            f0 = o0.astype(jnp.float32)
            f1 = o1.astype(jnp.float32)

            def fold(x):   # fold `chunk` rows onto `sub` sublanes (pure VPU adds)
                return x.reshape(chunk // sub, sub, lanes).sum(axis=0)

            i0, i1, q0, q1, t0, t1 = carry
            return (i0 + fold(p0 * f0), i1 + fold(p1 * f1),
                    q0 + fold(p0),      q1 + fold(p1),
                    t0 + fold(f0),      t1 + fold(f1))

        zero = jnp.zeros((sub, lanes), jnp.float32)
        sums = jax.lax.fori_loop(0, fold_steps, body, (zero,) * 6,
                                 unroll=min(2, fold_steps))
        for k in range(6):
            out_ref[k] += sums[k]

    if has_tail:
        is_last = rb == num_row_blocks - 1
        full_pred = jnp.logical_not(is_last)
        if needs_skip:
            full_pred = jnp.logical_and(full_pred, rb < num_row_blocks)

        @pl.when(full_pred)
        def _():
            accumulate(False)

        @pl.when(is_last)
        def _():
            accumulate(True)
    elif needs_skip:
        @pl.when(rb < num_row_blocks)
        def _():
            accumulate(False)
    else:
        accumulate(False)


def _dice_stats_small_kernel(pr_ref, gt_ref, out_ref):
    """Tiny-image path (< 32 lane-rows): one full-extent block, no masking.

    Stores elementwise products; the (tiny) reduction happens in the epilogue.
    """
    pr = pr_ref[...].astype(jnp.float32)     # (2, rows, 128)
    gt = gt_ref[...]
    o0 = (gt == 0).astype(jnp.float32)
    o1 = (gt == 1).astype(jnp.float32)
    out_ref[0] = pr[0] * o0
    out_ref[1] = pr[1] * o1
    out_ref[2] = pr[0]
    out_ref[3] = pr[1]
    out_ref[4] = o0
    out_ref[5] = o1


@functools.partial(jax.jit, static_argnames=("row_tile",))
def arrowfcn_ce_loss(pr, gt, row_tile=None):
    """JAX/Pallas equivalent of ArrowFCNCELoss.forward(pr, gt).

    pr : (N, C, H, W) float probabilities (from_logits=False); f32 or bf16
    gt : (N, H, W)    integer class labels in [0, C); narrow int dtypes pass through
    returns scalar float32 loss = 0.95 * dice_loss(class 1) + 0.05 * dice_loss(class 0)
    """
    N, C, H, W = pr.shape
    if C < _N_CLS:
        raise ValueError("ArrowFCNCELoss needs at least 2 classes (uses classes 0 and 1).")
    HW = H * W

    # Keep gt in its native narrow integer dtype when possible (no extra HBM pass).
    if gt.dtype.name not in ("int8", "uint8", "int16", "uint16", "int32", "uint32"):
        gt = gt.astype(jnp.int32)

    if HW % _LANES == 0:
        rows = HW // _LANES
        pr_r = pr.reshape(N, C, rows, _LANES)            # free, row-major reshape
        gt_r = gt.reshape(N, rows, _LANES)
    else:
        # Rare fallback: pixel count not a lane multiple -> pad once.
        # pr padded with 0 and gt with label 2 (never class 0/1) contribute nothing.
        hw_pad = pl.cdiv(HW, _LANES) * _LANES
        rows = hw_pad // _LANES
        pr_r = jnp.pad(pr.reshape(N, C, HW), ((0, 0), (0, 0), (0, hw_pad - HW)))
        pr_r = pr_r.reshape(N, C, rows, _LANES)
        gt_r = jnp.pad(gt.reshape(N, HW), ((0, 0), (0, hw_pad - HW)), constant_values=2)
        gt_r = gt_r.reshape(N, rows, _LANES)

    if rows < _CHUNK:
        # ---------- tiny-image path: one full-extent block per image ----------
        stats = pl.pallas_call(
            _dice_stats_small_kernel,
            out_shape=jax.ShapeDtypeStruct((N, 1, 6, rows, _LANES), jnp.float32),
            grid_spec=pltpu.PrefetchScalarGridSpec(
                num_scalar_prefetch=0,
                grid=(N,),
                in_specs=[
                    pl.BlockSpec((None, _N_CLS, rows, _LANES), lambda n: (n, 0, 0, 0)),
                    pl.BlockSpec((None, rows, _LANES), lambda n: (n, 0, 0)),
                ],
                out_specs=pl.BlockSpec((None, None, 6, rows, _LANES),
                                       lambda n: (n, 0, 0, 0, 0)),
            ),
            compiler_params=pltpu.CompilerParams(dimension_semantics=("parallel",)),
        )(pr_r, gt_r)
    else:
        # ---------- main streaming path ----------
        if row_tile is None:
            row_tile = _device_default_row_tile()
        row_tile = max(_CHUNK, (int(row_tile) // _CHUNK) * _CHUNK)

        # Row-block size: a multiple of _CHUNK, never larger than the row extent.
        R = min(row_tile, (rows // _CHUNK) * _CHUNK)
        if N == 1 and rows >= 2 * _CHUNK:
            # Guarantee >= 2 row blocks so the 2nd parallel axis can feed both
            # v7x TensorCores even for a single image.
            R = min(R, max(_CHUNK, (rows // (2 * _CHUNK)) * _CHUNK))

        num_row_blocks = pl.cdiv(rows, R)
        S = 2 if num_row_blocks >= 2 else 1           # row super-chunks (parallel axis)
        rs = pl.cdiv(num_row_blocks, S)               # row blocks per super-chunk
        has_tail = (rows % R) != 0                    # last block partially OOB
        needs_skip = (S * rs) != num_row_blocks       # split overshoots the block count

        kernel = functools.partial(
            _dice_stats_kernel, chunk=_CHUNK, num_row_blocks=num_row_blocks,
            blocks_per_super=rs, rows_total=rows, block_rows=R,
            has_tail=has_tail, needs_skip=needs_skip)

        def pr_map(n, s, r):
            return (n, 0, jnp.minimum(s * rs + r, num_row_blocks - 1), 0)

        def gt_map(n, s, r):
            return (n, jnp.minimum(s * rs + r, num_row_blocks - 1), 0)

        # Explicit scoped-VMEM limit so the default isn't the binding constraint.
        pr_bytes = _N_CLS * R * _LANES * pr_r.dtype.itemsize
        gt_bytes = R * _LANES * gt_r.dtype.itemsize
        vmem_limit = 2 * (pr_bytes + gt_bytes) + (16 << 20)     # double-buffer + headroom
        vmem_limit = int(min(max(vmem_limit, 32 << 20), 48 << 20))

        stats = pl.pallas_call(
            kernel,
            out_shape=jax.ShapeDtypeStruct((N, S, 6, _SUB, _LANES), jnp.float32),
            grid_spec=pltpu.PrefetchScalarGridSpec(
                num_scalar_prefetch=0,
                grid=(N, S, rs),
                in_specs=[
                    # Only classes 0 and 1 are fetched (block size 2 on the C axis).
                    pl.BlockSpec((None, _N_CLS, R, _LANES), pr_map),
                    pl.BlockSpec((None, R, _LANES), gt_map),
                ],
                out_specs=pl.BlockSpec((None, None, 6, _SUB, _LANES),
                                       lambda n, s, r: (n, s, 0, 0, 0)),
            ),
            compiler_params=pltpu.CompilerParams(
                dimension_semantics=("parallel", "parallel", "arbitrary"),
                vmem_limit_bytes=vmem_limit),
        )(pr_r, gt_r)

    # Tiny epilogue in plain JAX: fold lane-resident partial sums to per-class scalars.
    per = stats.sum(axis=(0, 1, 3, 4))        # (6,) = [i0, i1, p0, p1, t0, t1]
    inter = per[0:2]
    psum = per[2:4]
    tsum = per[4:6]

    smooth = 0.0
    eps = 1e-7
    # soft_dice_score: (2*I + smooth) / clamp_min(cardinality + smooth, eps)
    dice = (2.0 * inter + smooth) / jnp.maximum(psum + tsum + smooth, eps)
    loss_c = (1.0 - dice) * (tsum > 0).astype(jnp.float32)
    # class 1 = dice_fore (weight 0.95), class 0 = dice_back (weight 0.05)
    return (loss_c[1] * 0.95 + loss_c[0] * 0.05).astype(jnp.float32)


def _reference_loss(pr, gt):
    """Pure-JAX reference of the same math for sanity checking."""
    N, C, H, W = pr.shape
    pr2 = pr.reshape(N, C, H * W).astype(jnp.float32)
    onehot = jax.nn.one_hot(gt.reshape(N, H * W), C, dtype=jnp.float32)
    onehot = jnp.transpose(onehot, (0, 2, 1))                 # (N, C, HW)
    dims = (0, 2)
    inter = jnp.sum(pr2 * onehot, axis=dims)
    card = jnp.sum(pr2 + onehot, axis=dims)
    dice = (2.0 * inter) / jnp.maximum(card, 1e-7)
    loss_c = (1.0 - dice) * (jnp.sum(onehot, axis=dims) > 0).astype(jnp.float32)
    return loss_c[1] * 0.95 + loss_c[0] * 0.05


if __name__ == "__main__":
    key = jax.random.PRNGKey(0)
    keys = jax.random.split(key, 8)

    def make_case(kk, n, c, h, w, pr_dtype=jnp.float32, gt_dtype=jnp.int32):
        k1, k2 = jax.random.split(kk)
        logits = jax.random.normal(k1, (n, c, h, w), dtype=jnp.float32)
        pr = jax.nn.softmax(logits, axis=1).astype(pr_dtype)   # from_logits=False
        gt = jax.random.randint(k2, (n, h, w), 0, c, dtype=jnp.int32).astype(gt_dtype)
        return pr, gt

    def check(pr, gt, row_tile=None, tol=1e-5):
        loss = jax.block_until_ready(arrowfcn_ce_loss(pr, gt, row_tile=row_tile))
        ref = jax.block_until_ready(_reference_loss(pr, gt))
        assert jnp.allclose(loss, ref, atol=tol, rtol=tol), (loss, ref)

    # 1) main small case: chunked path, single row block per image.
    pr, gt = make_case(keys[0], 2, 2, 64, 64)
    check(pr, gt)

    # 2) N=1 row-split across 2 super-chunks, multiple revisited steps, no tail.
    pr, gt = make_case(keys[1], 1, 2, 128, 128)
    check(pr, gt, row_tile=32)

    # 3) masked partial last block + skipped overflow block of the super-split.
    pr, gt = make_case(keys[2], 1, 2, 96, 96)
    check(pr, gt, row_tile=32)

    # 4) tiny-image path with C > 2 (only planes 0/1 fetched).
    pr, gt = make_case(keys[3], 2, 4, 16, 16)
    check(pr, gt)

    # 5) H*W not a lane multiple -> pad fallback, tiny path.
    pr, gt = make_case(keys[4], 1, 2, 15, 15)
    check(pr, gt)

    # 6) bf16 probabilities + int8 labels, C > 2, chunked path with tail.
    pr, gt = make_case(keys[5], 1, 3, 80, 128,
                       pr_dtype=jnp.bfloat16, gt_dtype=jnp.int8)
    check(pr, gt, tol=1e-4)

    print("KERNEL_OK")
</pallas_src>

<mosaic_0001>
module attributes {stable_mosaic.version = 11 : i64} {
  func.func @_dice_stats_kernel(%arg0: i32, %arg1: i32, %arg2: i32, %arg3: memref<1x2x32x128xf32, #tpu.memory_space<vmem>>, %arg4: memref<1x32x128xi32, #tpu.memory_space<vmem>>, %arg5: memref<1x1x6x8x128xf32, #tpu.memory_space<vmem>>) attributes {dimension_semantics = [#tpu.dimension_semantics<parallel>, #tpu.dimension_semantics<parallel>, #tpu.dimension_semantics<arbitrary>], iteration_bounds = array<i64: 2, 1, 1>, scalar_prefetch = 0 : i64, scratch_operands = 0 : i64, tpu.core_type = #tpu.core_type<tc>, window_params = [{transform_indices = @transform_0, window_bounds = array<i64: 1, 2, 32, 128>}, {transform_indices = @transform_1, window_bounds = array<i64: 1, 32, 128>}, {transform_indices = @transform_2, window_bounds = array<i64: 1, 1, 6, 8, 128>}]} {
    %c0_i32 = arith.constant 0 : i32
    %0 = arith.cmpi eq, %arg2, %c0_i32 : i32
    %1 = arith.extui %0 : i1 to i32
    %c0_i32_0 = arith.constant 0 : i32
    %2 = arith.cmpi ne, %1, %c0_i32_0 : i32
    scf.if %2 {
      %cst_72 = arith.constant 0.000000e+00 : f32
      %79 = vector.broadcast %cst_72 : f32 to vector<6x8x128xf32>
      %c0_73 = arith.constant 0 : index
      %c0_74 = arith.constant 0 : index
      %c0_75 = arith.constant 0 : index
      %c0_76 = arith.constant 0 : index
      %c0_77 = arith.constant 0 : index
      %80 = vector.load %arg5[%c0_73, %c0_74, %c0_75, %c0_76, %c0_77] : memref<1x1x6x8x128xf32, #tpu.memory_space<vmem>>, vector<1x1x6x8x128xf32>
      %81 = vector.shape_cast %80 : vector<1x1x6x8x128xf32> to vector<6x8x128xf32>
      %82 = vector.shape_cast %79 : vector<6x8x128xf32> to vector<1x1x6x8x128xf32>
      tpu.vector_store %arg5[%c0_73, %c0_74, %c0_75, %c0_76, %c0_77], %82 {strides = array<i32>} : memref<1x1x6x8x128xf32, #tpu.memory_space<vmem>>, vector<1x1x6x8x128xf32>,
    } else {
    }
    %cst = arith.constant 0.000000e+00 : f32
    %3 = vector.broadcast %cst : f32 to vector<8x128xf32>
    %c0_i32_1 = arith.constant 0 : i32
    %c32_i32 = arith.constant 32 : i32
    %4 = arith.muli %c0_i32_1, %c32_i32 : i32
    %5 = tpu.assume_multiple %4, 32 : i32
    %c0 = arith.constant 0 : index
    %6 = arith.index_cast %5 : i32 to index
    %c0_2 = arith.constant 0 : index
    %7 = vector.load %arg4[%c0, %6, %c0_2] : memref<1x32x128xi32, #tpu.memory_space<vmem>>, vector<1x32x128xi32>
    %8 = vector.shape_cast %7 : vector<1x32x128xi32> to vector<32x128xi32>
    %c0_3 = arith.constant 0 : index
    %c0_4 = arith.constant 0 : index
    %9 = arith.index_cast %5 : i32 to index
    %c0_5 = arith.constant 0 : index
    %10 = vector.load %arg3[%c0_3, %c0_4, %9, %c0_5] : memref<1x2x32x128xf32, #tpu.memory_space<vmem>>, vector<1x1x32x128xf32>
    %11 = vector.shape_cast %10 : vector<1x1x32x128xf32> to vector<32x128xf32>
    %c0_6 = arith.constant 0 : index
    %c1 = arith.constant 1 : index
    %12 = arith.index_cast %5 : i32 to index
    %c0_7 = arith.constant 0 : index
    %13 = vector.load %arg3[%c0_6, %c1, %12, %c0_7] : memref<1x2x32x128xf32, #tpu.memory_space<vmem>>, vector<1x1x32x128xf32>
    %14 = vector.shape_cast %13 : vector<1x1x32x128xf32> to vector<32x128xf32>
    %c0_i32_8 = arith.constant 0 : i32
    %15 = vector.broadcast %c0_i32_8 : i32 to vector<32x128xi32>
    %16 = arith.cmpi eq, %8, %15 : vector<32x128xi32>
    %c1_i32 = arith.constant 1 : i32
    %17 = vector.broadcast %c1_i32 : i32 to vector<32x128xi32>
    %18 = arith.cmpi eq, %8, %17 : vector<32x128xi32>
    %19 = arith.extui %16 : vector<32x128xi1> to vector<32x128xi32>
    %20 = arith.sitofp %19 : vector<32x128xi32> to vector<32x128xf32>
    %21 = arith.extui %18 : vector<32x128xi1> to vector<32x128xi32>
    %22 = arith.sitofp %21 : vector<32x128xi32> to vector<32x128xf32>
    %23 = arith.mulf %11, %20 : vector<32x128xf32>
    %24 = vector.shape_cast %23 : vector<32x128xf32> to vector<4x8x128xf32>
    %cst_9 = arith.constant dense<0.000000e+00> : vector<8x128xf32>
    %25 = vector.multi_reduction <add>, %24, %cst_9 [0] : vector<4x8x128xf32> to vector<8x128xf32>
    %26 = arith.addf %3, %25 : vector<8x128xf32>
    %27 = arith.mulf %14, %22 : vector<32x128xf32>
    %28 = vector.shape_cast %27 : vector<32x128xf32> to vector<4x8x128xf32>
    %cst_10 = arith.constant dense<0.000000e+00> : vector<8x128xf32>
    %29 = vector.multi_reduction <add>, %28, %cst_10 [0] : vector<4x8x128xf32> to vector<8x128xf32>
    %30 = arith.addf %3, %29 : vector<8x128xf32>
    %31 = vector.shape_cast %11 : vector<32x128xf32> to vector<4x8x128xf32>
    %cst_11 = arith.constant dense<0.000000e+00> : vector<8x128xf32>
    %32 = vector.multi_reduction <add>, %31, %cst_11 [0] : vector<4x8x128xf32> to vector<8x128xf32>
    %33 = arith.addf %3, %32 : vector<8x128xf32>
    %34 = vector.shape_cast %14 : vector<32x128xf32> to vector<4x8x128xf32>
    %cst_12 = arith.constant dense<0.000000e+00> : vector<8x128xf32>
    %35 = vector.multi_reduction <add>, %34, %cst_12 [0] : vector<4x8x128xf32> to vector<8x128xf32>
    %36 = arith.addf %3, %35 : vector<8x128xf32>
    %37 = vector.shape_cast %20 : vector<32x128xf32> to vector<4x8x128xf32>
    %cst_13 = arith.constant dense<0.000000e+00> : vector<8x128xf32>
    %38 = vector.multi_reduction <add>, %37, %cst_13 [0] : vector<4x8x128xf32> to vector<8x128xf32>
    %39 = arith.addf %3, %38 : vector<8x128xf32>
    %40 = vector.shape_cast %22 : vector<32x128xf32> to vector<4x8x128xf32>
    %cst_14 = arith.constant dense<0.000000e+00> : vector<8x128xf32>
    %41 = vector.multi_reduction <add>, %40, %cst_14 [0] : vector<4x8x128xf32> to vector<8x128xf32>
    %42 = arith.addf %3, %41 : vector<8x128xf32>
    %c1_i32_15 = arith.constant 1 : i32
    %c0_16 = arith.constant 0 : index
    %c0_17 = arith.constant 0 : index
    %c0_18 = arith.constant 0 : index
    %c0_19 = arith.constant 0 : index
    %c0_20 = arith.constant 0 : index
    %43 = vector.load %arg5[%c0_16, %c0_17, %c0_18, %c0_19, %c0_20] : memref<1x1x6x8x128xf32, #tpu.memory_space<vmem>>, vector<1x1x1x8x128xf32>
    %44 = vector.shape_cast %43 : vector<1x1x1x8x128xf32> to vector<8x128xf32>
    %45 = arith.addf %44, %26 : vector<8x128xf32>
    %c0_21 = arith.constant 0 : index
    %c0_22 = arith.constant 0 : index
    %c0_23 = arith.constant 0 : index
    %c0_24 = arith.constant 0 : index
    %c0_25 = arith.constant 0 : index
    %46 = vector.load %arg5[%c0_21, %c0_22, %c0_23, %c0_24, %c0_25] : memref<1x1x6x8x128xf32, #tpu.memory_space<vmem>>, vector<1x1x1x8x128xf32>
    %47 = vector.shape_cast %46 : vector<1x1x1x8x128xf32> to vector<8x128xf32>
    %48 = vector.shape_cast %45 : vector<8x128xf32> to vector<1x1x1x8x128xf32>
    tpu.vector_store %arg5[%c0_21, %c0_22, %c0_23, %c0_24, %c0_25], %48 {strides = array<i32>} : memref<1x1x6x8x128xf32, #tpu.memory_space<vmem>>, vector<1x1x1x8x128xf32>,
    %c0_26 = arith.constant 0 : index
    %c0_27 = arith.constant 0 : index
    %c1_28 = arith.constant 1 : index
    %c0_29 = arith.constant 0 : index
    %c0_30 = arith.constant 0 : index
    %49 = vector.load %arg5[%c0_26, %c0_27, %c1_28, %c0_29, %c0_30] : memref<1x1x6x8x128xf32, #tpu.memory_space<vmem>>, vector<1x1x1x8x128xf32>
    %50 = vector.shape_cast %49 : vector<1x1x1x8x128xf32> to vector<8x128xf32>
    %51 = arith.addf %50, %30 : vector<8x128xf32>
    %c0_31 = arith.constant 0 : index
    %c0_32 = arith.constant 0 : index
    %c1_33 = arith.constant 1 : index
    %c0_34 = arith.constant 0 : index
    %c0_35 = arith.constant 0 : index
    %52 = vector.load %arg5[%c0_31, %c0_32, %c1_33, %c0_34, %c0_35] : memref<1x1x6x8x128xf32, #tpu.memory_space<vmem>>, vector<1x1x1x8x128xf32>
    %53 = vector.shape_cast %52 : vector<1x1x1x8x128xf32> to vector<8x128xf32>
    %54 = vector.shape_cast %51 : vector<8x128xf32> to vector<1x1x1x8x128xf32>
    tpu.vector_store %arg5[%c0_31, %c0_32, %c1_33, %c0_34, %c0_35], %54 {strides = array<i32>} : memref<1x1x6x8x128xf32, #tpu.memory_space<vmem>>, vector<1x1x1x8x128xf32>,
    %c0_36 = arith.constant 0 : index
    %c0_37 = arith.constant 0 : index
    %c2 = arith.constant 2 : index
    %c0_38 = arith.constant 0 : index
    %c0_39 = arith.constant 0 : index
    %55 = vector.load %arg5[%c0_36, %c0_37, %c2, %c0_38, %c0_39] : memref<1x1x6x8x128xf32, #tpu.memory_space<vmem>>, vector<1x1x1x8x128xf32>
    %56 = vector.shape_cast %55 : vector<1x1x1x8x128xf32> to vector<8x128xf32>
    %57 = arith.addf %56, %33 : vector<8x128xf32>
    %c0_40 = arith.constant 0 : index
    %c0_41 = arith.constant 0 : index
    %c2_42 = arith.constant 2 : index
    %c0_43 = arith.constant 0 : index
    %c0_44 = arith.constant 0 : index
    %58 = vector.load %arg5[%c0_40, %c0_41, %c2_42, %c0_43, %c0_44] : memref<1x1x6x8x128xf32, #tpu.memory_space<vmem>>, vector<1x1x1x8x128xf32>
    %59 = vector.shape_cast %58 : vector<1x1x1x8x128xf32> to vector<8x128xf32>
    %60 = vector.shape_cast %57 : vector<8x128xf32> to vector<1x1x1x8x128xf32>
    tpu.vector_store %arg5[%c0_40, %c0_41, %c2_42, %c0_43, %c0_44], %60 {strides = array<i32>} : memref<1x1x6x8x128xf32, #tpu.memory_space<vmem>>, vector<1x1x1x8x128xf32>,
    %c0_45 = arith.constant 0 : index
    %c0_46 = arith.constant 0 : index
    %c3 = arith.constant 3 : index
    %c0_47 = arith.constant 0 : index
    %c0_48 = arith.constant 0 : index
    %61 = vector.load %arg5[%c0_45, %c0_46, %c3, %c0_47, %c0_48] : memref<1x1x6x8x128xf32, #tpu.memory_space<vmem>>, vector<1x1x1x8x128xf32>
    %62 = vector.shape_cast %61 : vector<1x1x1x8x128xf32> to vector<8x128xf32>
    %63 = arith.addf %62, %36 : vector<8x128xf32>
    %c0_49 = arith.constant 0 : index
    %c0_50 = arith.constant 0 : index
    %c3_51 = arith.constant 3 : index
    %c0_52 = arith.constant 0 : index
    %c0_53 = arith.constant 0 : index
    %64 = vector.load %arg5[%c0_49, %c0_50, %c3_51, %c0_52, %c0_53] : memref<1x1x6x8x128xf32, #tpu.memory_space<vmem>>, vector<1x1x1x8x128xf32>
    %65 = vector.shape_cast %64 : vector<1x1x1x8x128xf32> to vector<8x128xf32>
    %66 = vector.shape_cast %63 : vector<8x128xf32> to vector<1x1x1x8x128xf32>
    tpu.vector_store %arg5[%c0_49, %c0_50, %c3_51, %c0_52, %c0_53], %66 {strides = array<i32>} : memref<1x1x6x8x128xf32, #tpu.memory_space<vmem>>, vector<1x1x1x8x128xf32>,
    %c0_54 = arith.constant 0 : index
    %c0_55 = arith.constant 0 : index
    %c4 = arith.constant 4 : index
    %c0_56 = arith.constant 0 : index
    %c0_57 = arith.constant 0 : index
    %67 = vector.load %arg5[%c0_54, %c0_55, %c4, %c0_56, %c0_57] : memref<1x1x6x8x128xf32, #tpu.memory_space<vmem>>, vector<1x1x1x8x128xf32>
    %68 = vector.shape_cast %67 : vector<1x1x1x8x128xf32> to vector<8x128xf32>
    %69 = arith.addf %68, %39 : vector<8x128xf32>
    %c0_58 = arith.constant 0 : index
    %c0_59 = arith.constant 0 : index
    %c4_60 = arith.constant 4 : index
    %c0_61 = arith.constant 0 : index
    %c0_62 = arith.constant 0 : index
    %70 = vector.load %arg5[%c0_58, %c0_59, %c4_60, %c0_61, %c0_62] : memref<1x1x6x8x128xf32, #tpu.memory_space<vmem>>, vector<1x1x1x8x128xf32>
    %71 = vector.shape_cast %70 : vector<1x1x1x8x128xf32> to vector<8x128xf32>
    %72 = vector.shape_cast %69 : vector<8x128xf32> to vector<1x1x1x8x128xf32>
    tpu.vector_store %arg5[%c0_58, %c0_59, %c4_60, %c0_61, %c0_62], %72 {strides = array<i32>} : memref<1x1x6x8x128xf32, #tpu.memory_space<vmem>>, vector<1x1x1x8x128xf32>,
    %c0_63 = arith.constant 0 : index
    %c0_64 = arith.constant 0 : index
    %c5 = arith.constant 5 : index
    %c0_65 = arith.constant 0 : index
    %c0_66 = arith.constant 0 : index
    %73 = vector.load %arg5[%c0_63, %c0_64, %c5, %c0_65, %c0_66] : memref<1x1x6x8x128xf32, #tpu.memory_space<vmem>>, vector<1x1x1x8x128xf32>
    %74 = vector.shape_cast %73 : vector<1x1x1x8x128xf32> to vector<8x128xf32>
    %75 = arith.addf %74, %42 : vector<8x128xf32>
    %c0_67 = arith.constant 0 : index
    %c0_68 = arith.constant 0 : index
    %c5_69 = arith.constant 5 : index
    %c0_70 = arith.constant 0 : index
    %c0_71 = arith.constant 0 : index
    %76 = vector.load %arg5[%c0_67, %c0_68, %c5_69, %c0_70, %c0_71] : memref<1x1x6x8x128xf32, #tpu.memory_space<vmem>>, vector<1x1x1x8x128xf32>
    %77 = vector.shape_cast %76 : vector<1x1x1x8x128xf32> to vector<8x128xf32>
    %78 = vector.shape_cast %75 : vector<8x128xf32> to vector<1x1x1x8x128xf32>
    tpu.vector_store %arg5[%c0_67, %c0_68, %c5_69, %c0_70, %c0_71], %78 {strides = array<i32>} : memref<1x1x6x8x128xf32, #tpu.memory_space<vmem>>, vector<1x1x1x8x128xf32>,
    return
  }
  func.func @transform_0(%arg0: i32, %arg1: i32, %arg2: i32) -> (i32, i32, i32, i32) {
    %c1_i32 = arith.constant 1 : i32
    %0 = arith.muli %arg1, %c1_i32 : i32
    %1 = arith.addi %0, %arg2 : i32
    %c0_i32 = arith.constant 0 : i32
    %2 = arith.minsi %1, %c0_i32 : i32
    %c0_i32_0 = arith.constant 0 : i32
    %c0_i32_1 = arith.constant 0 : i32
    %c0_i32_2 = arith.constant 0 : i32
    return %arg0, %c0_i32_0, %2, %c0_i32_1 : i32, i32, i32, i32
  }
  func.func @transform_1(%arg0: i32, %arg1: i32, %arg2: i32) -> (i32, i32, i32) {
    %c1_i32 = arith.constant 1 : i32
    %0 = arith.muli %arg1, %c1_i32 : i32
    %1 = arith.addi %0, %arg2 : i32
    %c0_i32 = arith.constant 0 : i32
    %2 = arith.minsi %1, %c0_i32 : i32
    %c0_i32_0 = arith.constant 0 : i32
    %c0_i32_1 = arith.constant 0 : i32
    return %arg0, %2, %c0_i32_0 : i32, i32, i32
  }
  func.func @transform_2(%arg0: i32, %arg1: i32, %arg2: i32) -> (i32, i32, i32, i32, i32) {
    %c0_i32 = arith.constant 0 : i32
    %c0_i32_0 = arith.constant 0 : i32
    %c0_i32_1 = arith.constant 0 : i32
    %c0_i32_2 = arith.constant 0 : i32
    return %arg0, %arg1, %c0_i32, %c0_i32_0, %c0_i32_1 : i32, i32, i32, i32, i32
  }
}

</mosaic_0001>

<bundles_post_ra>
// kernel: arrowfcn_ce_loss.1
= control target key start
LH: loop header
LB: loop body
LE: loop exit
PB: predicated region body
PF: predicated region fallthrough
CT: control target
= control target key end

     0   :  { %s583_s9 = smov 0   ;;  %s585_s10 = smov 0   ;;  %s624_s0 = inlined_call_operand.vmem [shape: f32[2,2,32,128], index: 0, kind: input, shape index: {}]   ;;  %s625_s1 = inlined_call_operand.vmem [shape: s32[2,32,128], index: 1, kind: input, shape index: {}]   ;;  %s626_s2 = inlined_call_operand.vmem [shape: f32[2,1,6,8,128], index: 2, kind: output, shape index: {}]  }
   0x1   :  { %s587_s11 = smov 0  }
   0x2 LB: > { %s31_s12 = sadd.s32 1, %s561_s10  ;;  %p485_p0 = scmp.ge.s32.totalorder %s565_s11, 1  ;;  %s565_s11 = sphi %s587_s11, %s12_s11   ;;  %s561_s10 = sphi %s585_s10, %s628_s10   ;;  %s557_s9 = sphi %s583_s9, %s627_s9  }
   0x3   : > { %p33_p1 = scmp.ge.s32.totalorder %s31_s12, 2  ;;  %p181_p2 = scmp.lt.s32.totalorder %s565_s11, 3 }
   0x5   : > { %s630_s12 = smov (%p33_p1, %s31_s12), 0  ;;  %p182_p3 = pnand %p485_p0, %p181_p2 }
   0x6   : > { %p230_p4 = scmp.lt.s32.totalorder (!%p182_p3), %s557_s9, 1 }
   0x7   : > { %185 = sbr.rel (%p182_p3) target bundleno = 34 (0x22), region = 28 }
   0xc   : > { %s632_s9 = smov (!%p230_p4, %s557_s9), 1  ;;  %v567_v9 = vmov 0.0  }
   0xd   : > { %s515_s13 = sshll.u32 %s632_s9, 6  ;;  %s516_s17 = sshll.u32 %s632_s9, 5 }
   0xe   : > { %s237_s16 = scalar_lea.vmem %s624_s0, %s515_s13  ;;  %s253_s20 = scalar_lea.vmem %s625_s1, %s516_s17 }
   0xf   : > { %v281_v0 = vld [vmem:[%s237_s16] sm:$0xff]  ;;  %v282_v1 = vld [vmem:[%s237_s16 + $0x8] sm:$0xff]  ;;  %v283_v2 = vld [vmem:[%s237_s16 + $0x10] sm:$0xff]  ;;  %s517_s21 = smul.u32 48, %s632_s9 }
  0x10   : > { %v277_v3 = vld [vmem:[%s253_s20] sm:$0xff]  ;;  %v278_v4 = vld [vmem:[%s253_s20 + $0x8] sm:$0xff]  ;;  %v279_v5 = vld [vmem:[%s253_s20 + $0x10] sm:$0xff]  ;;  %v331_v8 = vadd.f32 %v282_v1, %v281_v0 }
  0x11   : > { %v280_v6 = vld [vmem:[%s253_s20 + $0x18] sm:$0xff]  ;;  %vm291_vm0 = vcmp.eq.s32.totalorder %v277_v3, 0  ;;  %vm292_vm1 = vcmp.eq.s32.totalorder %v278_v4, 0  ;;  %vm293_vm2 = vcmp.eq.s32.totalorder %v279_v5, 0  ;;  %v491_v17 = vld [vmem:[%s237_s16 + $0x20] sm:$0xff]  ;;  %v492_v18 = vld [vmem:[%s237_s16 + $0x28] sm:$0xff]  ;;  %s266_s24 = scalar_lea.vmem %s626_s2, %s517_s21 }
  0x12   : > { %v284_v7 = vld [vmem:[%s237_s16 + $0x18] sm:$0xff]  ;;  %vm294_vm3 = vcmp.eq.s32.totalorder %v280_v6, 0  ;;  %v495_v10 = vsel %vm291_vm0, 1.0, %v567_v9  ;;  %v496_v11 = vsel %vm292_vm1, 1.0, %v567_v9  ;;  %v497_v12 = vsel %vm293_vm2, 1.0, %v567_v9  ;;  %v493_v20 = vld [vmem:[%s237_s16 + $0x30] sm:$0xff] }
  0x13   : > { %v498_v13 = vsel %vm294_vm3, 1.0, %v567_v9  ;;  %v315_v14 = vmul.f32 %v495_v10, %v281_v0  ;;  %v316_v15 = vmul.f32 %v496_v11, %v282_v1  ;;  %v317_v16 = vmul.f32 %v497_v12, %v283_v2  ;;  %v494_v21 = vld [vmem:[%s237_s16 + $0x38] sm:$0xff] }
  0x14   : > { %v318_v19 = vmul.f32 %v498_v13, %v284_v7  ;;  %vm295_vm4 = vcmp.eq.s32.totalorder %v277_v3, 1  ;;  %vm296_vm5 = vcmp.eq.s32.totalorder %v278_v4, 1  ;;  %vm297_vm6 = vcmp.eq.s32.totalorder %v279_v5, 1 }
  0x15   : > { %v319_v22 = vadd.f32 %v316_v15, %v315_v14  ;;  %vm298_vm7 = vcmp.eq.s32.totalorder %v280_v6, 1  ;;  %v499_v23 = vsel %vm295_vm4, 1.0, %v567_v9  ;;  %v500_v24 = vsel %vm296_vm5, 1.0, %v567_v9 }
  0x16   : > { %v501_v25 = vsel %vm297_vm6, 1.0, %v567_v9  ;;  %v502_v26 = vsel %vm298_vm7, 1.0, %v567_v9  ;;  %v323_v27 = vmul.f32 %v499_v23, %v491_v17  ;;  %v324_v28 = vmul.f32 %v500_v24, %v492_v18 }
  0x17   : > { %v320_v29 = vadd.f32 %v319_v22, %v317_v16  ;;  %v325_v30 = vmul.f32 %v501_v25, %v493_v20  ;;  %v326_v31 = vmul.f32 %v502_v26, %v494_v21  ;;  %v332_v32 = vadd.f32 %v331_v8, %v283_v2 }
  0x18   : > { %v327_v33 = vadd.f32 %v324_v28, %v323_v27  ;;  %v335_v34 = vadd.f32 %v492_v18, %v491_v17  ;;  %v339_v35 = vadd.f32 %v496_v11, %v495_v10  ;;  %v343_v36 = vadd.f32 %v500_v24, %v499_v23 }
  0x19   : > { %v321_v37 = vadd.f32 %v320_v29, %v318_v19  ;;  %v333_v38 = vadd.f32 %v332_v32, %v284_v7 }
  0x1a   : > { %v328_v39 = vadd.f32 %v327_v33, %v325_v30  ;;  %v336_v40 = vadd.f32 %v493_v20, %v335_v34  ;;  %v340_v41 = vadd.f32 %v497_v12, %v339_v35  ;;  %v344_v42 = vadd.f32 %v501_v25, %v343_v36 }
  0x1b   : > { %349 = vst [vmem:[%s266_s24] sm:$0xff] %v321_v37 }
  0x1c   : > { %v329_v43 = vadd.f32 %v328_v39, %v326_v31  ;;  %v337_v44 = vadd.f32 %v494_v21, %v336_v40  ;;  %v341_v45 = vadd.f32 %v498_v13, %v340_v41  ;;  %v345_v46 = vadd.f32 %v502_v26, %v344_v42  ;;  %506 = vst [vmem:[%s266_s24 + $0x10] sm:$0xff] %v333_v38 }
  0x1e   : > { %504 = vst [vmem:[%s266_s24 + $0x8] sm:$0xff] %v329_v43 }
  0x1f   : > { %508 = vst [vmem:[%s266_s24 + $0x18] sm:$0xff] %v337_v44 }
  0x20   : > { %510 = vst [vmem:[%s266_s24 + $0x20] sm:$0xff] %v341_v45 }
  0x21   : > { %512 = vst [vmem:[%s266_s24 + $0x28] sm:$0xff] %v345_v46 }
  0x22 PF: > { %s12_s11 = sadd.s32 1, %s565_s11   ;;  %s627_s9 = smov %s561_s10 }
  0x23   : > { %p9_p5 = scmp.ge.s32.totalorder %s12_s11, 4   ;;  %s628_s10 = smov %s630_s12 }
  0x25   :  { %11 = sbr.rel (!%p9_p5) target bundleno = 2 (0x2), region = 71 }

</bundles_post_ra>
